<compile_context>
chip_gen: v6e
topology: v6e:2x2x1
jax: 0.10.0
libtpu: 0.0.40
codegen_flags: <defaults>
</compile_context>

<pallas_src>
import jax
import jax.numpy as jnp
from jax.experimental import pallas as pl
from jax.experimental.pallas import tpu as pltpu

LANE = 128        # every feature dim padded to one full lane group
SUB = 16          # bf16 sublane-pack alignment for weight-blob row offsets
NEG = -1e30       # finite sentinel: padded classes excluded from log-sum-exp


def _round_up(x, m):
    return ((x + m - 1) // m) * m


# ------------------------------ wrapper ------------------------------------ #
def text_image_resnet_forward(text, image, label, params):
    """text: (B, Tin) f32; image: (B, C, H, W) f32; label: (B,) int32."""
    f32 = jnp.float32
    bf16 = jnp.bfloat16

    B, text_in = text.shape
    C = image.shape[1]
    t_feat = params["wt"].shape[1]
    i_feat = params["wi"].shape[1]
    fusion_in = t_feat + i_feat
    fusion_out = params["wf"].shape[1]
    hidden_sz = params["w1"].shape[1]
    num_classes = params["w2"].shape[1]

    # segment K extents, rounded to the bf16 sublane-pack (16 rows)
    tin_pad = _round_up(text_in, SUB)
    c_pad = _round_up(C, SUB)
    k_tow = tin_pad + c_pad
    k_f = _round_up(fusion_in, SUB)
    k_1 = _round_up(fusion_out, SUB)
    k_2 = _round_up(hidden_sz, SUB)

    # --- image tower preamble: global average pool hoisted to XLA ---------- #
    pooled = jnp.mean(image.reshape(B, C, -1).astype(f32), axis=-1)        # (B, C)

    # --- activation blob: [text | pooled]  (B, k_tow) bf16 ------------------ #
    text_p = jnp.pad(text.astype(f32), ((0, 0), (0, tin_pad - text_in)))
    pooled_p = jnp.pad(pooled, ((0, 0), (0, c_pad - C)))
    x = jnp.concatenate([text_p, pooled_p], axis=1).astype(bf16)
    label2d = label.reshape(B, 1).astype(jnp.int32)

    # --- weight blob (bf16): block-diag towers | fusion | fc1 | fc2 --------- #
    w_tow = jnp.zeros((k_tow, LANE), f32)
    w_tow = w_tow.at[:text_in, :t_feat].set(params["wt"].astype(f32))
    w_tow = w_tow.at[tin_pad:tin_pad + C, t_feat:fusion_in].set(
        params["wi"].astype(f32))

    def padw(w, rows):
        r, c = w.shape
        return jnp.pad(w.astype(f32), ((0, rows - r), (0, LANE - c)))

    wblob = jnp.concatenate(
        [w_tow,
         padw(params["wf"], k_f),
         padw(params["w1"], k_1),
         padw(params["w2"], k_2)],
        axis=0,
    ).astype(bf16)                                                         # (224,128)

    # --- bias blob (f32): one 8-row-aligned slot per bias ------------------- #
    def bias_slot(b, fill=0.0):
        b = jnp.asarray(b, f32).reshape(1, -1)
        row = jnp.pad(b, ((0, 0), (0, LANE - b.shape[-1])), constant_values=fill)
        return jnp.pad(row, ((0, 7), (0, 0)))                              # (8,128)

    b_tow = jnp.concatenate(
        [jnp.asarray(params["bt"], f32).reshape(1, -1),
         jnp.asarray(params["bi"], f32).reshape(1, -1)], axis=1)           # [bt|bi]
    bblob = jnp.concatenate(
        [bias_slot(b_tow),                 # rows  0.. 7  tower biases
         bias_slot(params["bf"]),          # rows  8..15  fusion bias
         bias_slot(params["b1"]),          # rows 16..23  fc1 bias
         bias_slot(params["b2"], NEG)],    # rows 24..31  fc2 bias (NEG-padded)
        axis=0,
    )                                                                      # (32,128)

    # static row offsets in the weight blob (all multiples of SUB=16)
    o_wt = 0
    o_wf = o_wt + k_tow
    o_w1 = o_wf + k_f
    o_w2 = o_w1 + k_1
    inv_b = 1.0 / B

    # --------------------------- fused kernel ------------------------------ #
    def kernel(x_ref, label_ref, w_ref, b_ref, logits_ref, loss_ref):
        xv = x_ref[...]                                    # (B, k_tow) bf16

        # Both towers in a single block-diagonal dot:
        #   cols [0, t_feat)          = relu(text   @ Wt + bt)
        #   cols [t_feat, fusion_in)  = relu(pooled @ Wi + bi)
        #   cols [fusion_in, 128)     = 0
        combined = jnp.maximum(
            jnp.dot(xv, w_ref[o_wt:o_wt + k_tow, :],
                    preferred_element_type=f32) + b_ref[0:1, :], 0.0)

        # early fusion: relu(cat([t, i]) @ Wf + bf); dropout (eval) == identity
        fused = jnp.maximum(
            jnp.dot(combined[:, :k_f].astype(bf16),
                    w_ref[o_wf:o_wf + k_f, :],
                    preferred_element_type=f32) + b_ref[8:9, :], 0.0)

        # classifier head
        hidden = jnp.maximum(
            jnp.dot(fused[:, :k_1].astype(bf16),
                    w_ref[o_w1:o_w1 + k_1, :],
                    preferred_element_type=f32) + b_ref[16:17, :], 0.0)
        logits = jnp.dot(hidden[:, :k_2].astype(bf16),
                         w_ref[o_w2:o_w2 + k_2, :],
                         preferred_element_type=f32) + b_ref[24:25, :]
        logits_ref[...] = logits                           # lane-dense (B,128) store

        # cross-entropy (mean over batch, integer labels). Padded classes have
        # logit = -1e30 (finite): exp underflows to 0 in the LSE and the label
        # one-hot never selects them (0 * -1e30 = -0.0, no NaN).
        m = jnp.max(logits, axis=-1, keepdims=True)
        lse = m + jnp.log(jnp.sum(jnp.exp(logits - m), axis=-1, keepdims=True))
        cls = jax.lax.broadcasted_iota(jnp.int32, logits.shape, 1)
        onehot = (cls == label_ref[...]).astype(f32)
        correct = jnp.sum(onehot * logits, axis=-1, keepdims=True)
        loss_ref[0] = jnp.sum(lse - correct) * inv_b       # scalar via SMEM

    # advisory cost estimate so XLA schedules around the tiny custom call
    flops = 2 * B * LANE * (k_tow + k_f + k_1 + k_2)
    transcendentals = B * LANE + B
    bytes_accessed = (2 * (x.size + wblob.size)            # bf16 operands
                      + 4 * (bblob.size + label2d.size + B * LANE + 1))

    vmem = pl.BlockSpec(memory_space=pltpu.MemorySpace.VMEM)
    smem = pl.BlockSpec(memory_space=pltpu.MemorySpace.SMEM)

    logits_pad, loss = pl.pallas_call(
        kernel,
        out_shape=(
            jax.ShapeDtypeStruct((B, LANE), jnp.float32),
            jax.ShapeDtypeStruct((1,), jnp.float32),
        ),
        in_specs=[vmem, vmem, vmem, vmem],
        out_specs=(vmem, smem),
        cost_estimate=pl.CostEstimate(
            flops=int(flops),
            transcendentals=int(transcendentals),
            bytes_accessed=int(bytes_accessed),
        ),
    )(x, label2d, wblob, bblob)

    return logits_pad[:, :num_classes], loss[0]


# --------------------------- pure-JAX reference ----------------------------- #
def reference_forward(text, image, label, params):
    tf = jax.nn.relu(text @ params["wt"] + params["bt"])
    pooled = jnp.mean(image.reshape(image.shape[0], image.shape[1], -1), axis=-1)
    imf = jax.nn.relu(pooled @ params["wi"] + params["bi"])
    combined = jnp.concatenate([tf, imf], axis=1)
    fused = jax.nn.relu(combined @ params["wf"] + params["bf"])
    hidden = jax.nn.relu(fused @ params["w1"] + params["b1"])
    logits = hidden @ params["w2"] + params["b2"]
    logp = jax.nn.log_softmax(logits, axis=-1)
    loss = -jnp.mean(jnp.take_along_axis(logp, label[:, None], axis=1))
    return logits, loss


# --------------------------------- main ------------------------------------ #
if __name__ == "__main__":
    B = 2
    TEXT_IN = 16
    C, H, W = 4, 16, 16
    TEXT_FEAT = 32          # text_feature_dim
    IMG_FEAT = 32           # image_feature_dim
    FUSION_OUT = 64         # fusion_output_size
    HIDDEN = 64             # hidden_size (scaled down from 512)
    NUM_CLASSES = 8

    key = jax.random.PRNGKey(0)
    ks = jax.random.split(key, 16)

    def init_linear(kw, kb, fan_in, fan_out):
        w = jax.random.normal(kw, (fan_in, fan_out), jnp.float32) * 0.05
        b = jax.random.normal(kb, (1, fan_out), jnp.float32) * 0.01
        return w, b

    wt, bt = init_linear(ks[0], ks[1], TEXT_IN, TEXT_FEAT)
    wi, bi = init_linear(ks[2], ks[3], C, IMG_FEAT)
    wf, bf = init_linear(ks[4], ks[5], TEXT_FEAT + IMG_FEAT, FUSION_OUT)
    w1, b1 = init_linear(ks[6], ks[7], FUSION_OUT, HIDDEN)
    w2, b2 = init_linear(ks[8], ks[9], HIDDEN, NUM_CLASSES)

    params = dict(
        wt=wt, bt=bt, wi=wi, bi=bi,
        wf=wf, bf=bf,
        w1=w1, b1=b1, w2=w2, b2=b2,
    )

    text = jax.random.normal(ks[10], (B, TEXT_IN), jnp.float32)
    image = jax.random.normal(ks[11], (B, C, H, W), jnp.float32)  # NCHW
    label = jax.random.randint(ks[12], (B,), 0, NUM_CLASSES, jnp.int32)

    logits, loss = text_image_resnet_forward(text, image, label, params)
    jax.block_until_ready((logits, loss))

    ref_logits, ref_loss = reference_forward(text, image, label, params)
    assert logits.shape == (B, NUM_CLASSES)
    # bf16 MXU operands (f32 accumulation) -> loosened tolerance vs f32 reference.
    assert jnp.allclose(logits, ref_logits, atol=5e-2, rtol=5e-2)
    assert jnp.allclose(loss, ref_loss, atol=5e-2, rtol=5e-2)

    print("KERNEL_OK")
</pallas_src>

<mosaic_0001>
module attributes {stable_mosaic.version = 11 : i64} {
  func.func @kernel(%arg0: memref<2x32xbf16, #tpu.memory_space<vmem>>, %arg1: memref<2x1xi32, #tpu.memory_space<vmem>>, %arg2: memref<224x128xbf16, #tpu.memory_space<vmem>>, %arg3: memref<32x128xf32, #tpu.memory_space<vmem>>, %arg4: memref<2x128xf32, #tpu.memory_space<vmem>>, %arg5: memref<1xf32, #tpu.memory_space<smem>>) attributes {dimension_semantics = [], scalar_prefetch = 0 : i64, scratch_operands = 0 : i64, tpu.core_type = #tpu.core_type<tc>} {
    %c0 = arith.constant 0 : index
    %c0_0 = arith.constant 0 : index
    %0 = vector.load %arg0[%c0, %c0_0] : memref<2x32xbf16, #tpu.memory_space<vmem>>, vector<2x32xbf16>
    %c0_1 = arith.constant 0 : index
    %c0_2 = arith.constant 0 : index
    %1 = vector.load %arg2[%c0_1, %c0_2] : memref<224x128xbf16, #tpu.memory_space<vmem>>, vector<32x128xbf16>
    %cst = arith.constant dense<0.000000e+00> : vector<2x128xf32>
    %2 = tpu.matmul %0, %1, %cst {dimension_numbers = #tpu.dot_dimension_numbers<[1], [0], [0], [1], [0, 0, 1, 1], [], []>} : vector<2x32xbf16>, vector<32x128xbf16>, vector<2x128xf32> -> vector<2x128xf32>
    %c0_3 = arith.constant 0 : index
    %c0_4 = arith.constant 0 : index
    %3 = vector.load %arg3[%c0_3, %c0_4] : memref<32x128xf32, #tpu.memory_space<vmem>>, vector<1x128xf32>
    %4 = vector.broadcast %3 : vector<1x128xf32> to vector<2x128xf32>
    %5 = arith.addf %2, %4 : vector<2x128xf32>
    %cst_5 = arith.constant 0.000000e+00 : f32
    %6 = vector.broadcast %cst_5 : f32 to vector<2x128xf32>
    %7 = arith.maximumf %5, %6 : vector<2x128xf32>
    %8 = vector.extract_strided_slice %7 {offsets = [0, 0], sizes = [2, 64], strides = [1, 1]} : vector<2x128xf32> to vector<2x64xf32>
    %9 = arith.truncf %8 : vector<2x64xf32> to vector<2x64xbf16>
    %c32 = arith.constant 32 : index
    %c0_6 = arith.constant 0 : index
    %10 = vector.load %arg2[%c32, %c0_6] : memref<224x128xbf16, #tpu.memory_space<vmem>>, vector<64x128xbf16>
    %cst_7 = arith.constant dense<0.000000e+00> : vector<2x128xf32>
    %11 = tpu.matmul %9, %10, %cst_7 {dimension_numbers = #tpu.dot_dimension_numbers<[1], [0], [0], [1], [0, 0, 1, 1], [], []>} : vector<2x64xbf16>, vector<64x128xbf16>, vector<2x128xf32> -> vector<2x128xf32>
    %c8 = arith.constant 8 : index
    %c0_8 = arith.constant 0 : index
    %12 = vector.load %arg3[%c8, %c0_8] : memref<32x128xf32, #tpu.memory_space<vmem>>, vector<1x128xf32>
    %13 = vector.broadcast %12 : vector<1x128xf32> to vector<2x128xf32>
    %14 = arith.addf %11, %13 : vector<2x128xf32>
    %cst_9 = arith.constant 0.000000e+00 : f32
    %15 = vector.broadcast %cst_9 : f32 to vector<2x128xf32>
    %16 = arith.maximumf %14, %15 : vector<2x128xf32>
    %17 = vector.extract_strided_slice %16 {offsets = [0, 0], sizes = [2, 64], strides = [1, 1]} : vector<2x128xf32> to vector<2x64xf32>
    %18 = arith.truncf %17 : vector<2x64xf32> to vector<2x64xbf16>
    %c96 = arith.constant 96 : index
    %c0_10 = arith.constant 0 : index
    %19 = vector.load %arg2[%c96, %c0_10] : memref<224x128xbf16, #tpu.memory_space<vmem>>, vector<64x128xbf16>
    %cst_11 = arith.constant dense<0.000000e+00> : vector<2x128xf32>
    %20 = tpu.matmul %18, %19, %cst_11 {dimension_numbers = #tpu.dot_dimension_numbers<[1], [0], [0], [1], [0, 0, 1, 1], [], []>} : vector<2x64xbf16>, vector<64x128xbf16>, vector<2x128xf32> -> vector<2x128xf32>
    %c16 = arith.constant 16 : index
    %c0_12 = arith.constant 0 : index
    %21 = vector.load %arg3[%c16, %c0_12] : memref<32x128xf32, #tpu.memory_space<vmem>>, vector<1x128xf32>
    %22 = vector.broadcast %21 : vector<1x128xf32> to vector<2x128xf32>
    %23 = arith.addf %20, %22 : vector<2x128xf32>
    %cst_13 = arith.constant 0.000000e+00 : f32
    %24 = vector.broadcast %cst_13 : f32 to vector<2x128xf32>
    %25 = arith.maximumf %23, %24 : vector<2x128xf32>
    %26 = vector.extract_strided_slice %25 {offsets = [0, 0], sizes = [2, 64], strides = [1, 1]} : vector<2x128xf32> to vector<2x64xf32>
    %27 = arith.truncf %26 : vector<2x64xf32> to vector<2x64xbf16>
    %c160 = arith.constant 160 : index
    %c0_14 = arith.constant 0 : index
    %28 = vector.load %arg2[%c160, %c0_14] : memref<224x128xbf16, #tpu.memory_space<vmem>>, vector<64x128xbf16>
    %cst_15 = arith.constant dense<0.000000e+00> : vector<2x128xf32>
    %29 = tpu.matmul %27, %28, %cst_15 {dimension_numbers = #tpu.dot_dimension_numbers<[1], [0], [0], [1], [0, 0, 1, 1], [], []>} : vector<2x64xbf16>, vector<64x128xbf16>, vector<2x128xf32> -> vector<2x128xf32>
    %c24 = arith.constant 24 : index
    %c0_16 = arith.constant 0 : index
    %30 = vector.load %arg3[%c24, %c0_16] : memref<32x128xf32, #tpu.memory_space<vmem>>, vector<1x128xf32>
    %31 = vector.broadcast %30 : vector<1x128xf32> to vector<2x128xf32>
    %32 = arith.addf %29, %31 : vector<2x128xf32>
    %c0_17 = arith.constant 0 : index
    %c0_18 = arith.constant 0 : index
    %33 = vector.load %arg4[%c0_17, %c0_18] : memref<2x128xf32, #tpu.memory_space<vmem>>, vector<2x128xf32>
    tpu.vector_store %arg4[%c0_17, %c0_18], %32 {strides = array<i32>} : memref<2x128xf32, #tpu.memory_space<vmem>>, vector<2x128xf32>,
    %cst_19 = arith.constant dense<0xFF800000> : vector<2xf32>
    %34 = vector.multi_reduction <maximumf>, %32, %cst_19 [1] : vector<2x128xf32> to vector<2xf32>
    %35 = vector.shape_cast %34 : vector<2xf32> to vector<2x1xf32>
    %36 = vector.broadcast %35 : vector<2x1xf32> to vector<2x128xf32>
    %37 = arith.subf %32, %36 : vector<2x128xf32>
    %38 = math.exp %37 : vector<2x128xf32>
    %cst_20 = arith.constant dense<0.000000e+00> : vector<2xf32>
    %39 = vector.multi_reduction <add>, %38, %cst_20 [1] : vector<2x128xf32> to vector<2xf32>
    %40 = vector.shape_cast %39 : vector<2xf32> to vector<2x1xf32>
    %41 = math.log %40 : vector<2x1xf32>
    %42 = arith.addf %35, %41 : vector<2x1xf32>
    %43 = tpu.iota {dimensions = array<i32: 1>} : vector<2x128xi32>
    %c0_21 = arith.constant 0 : index
    %c0_22 = arith.constant 0 : index
    %44 = vector.load %arg1[%c0_21, %c0_22] : memref<2x1xi32, #tpu.memory_space<vmem>>, vector<2x1xi32>
    %45 = vector.broadcast %44 : vector<2x1xi32> to vector<2x128xi32>
    %46 = arith.cmpi eq, %43, %45 : vector<2x128xi32>
    %47 = arith.extui %46 : vector<2x128xi1> to vector<2x128xi32>
    %48 = arith.sitofp %47 : vector<2x128xi32> to vector<2x128xf32>
    %49 = arith.mulf %48, %32 : vector<2x128xf32>
    %cst_23 = arith.constant dense<0.000000e+00> : vector<2xf32>
    %50 = vector.multi_reduction <add>, %49, %cst_23 [1] : vector<2x128xf32> to vector<2xf32>
    %51 = vector.shape_cast %50 : vector<2xf32> to vector<2x1xf32>
    %52 = arith.subf %42, %51 : vector<2x1xf32>
    %53 = vector.shape_cast %52 : vector<2x1xf32> to vector<1x2x1xf32>
    %cst_24 = arith.constant dense<0.000000e+00> : vector<1xf32>
    %54 = vector.multi_reduction <add>, %53, %cst_24 [1, 2] : vector<1x2x1xf32> to vector<1xf32>
    %55 = vector.shape_cast %54 : vector<1xf32> to vector<1x1x1xf32>
    %56 = vector.extract %55[0, 0, 0] : f32 from vector<1x1x1xf32>
    %cst_25 = arith.constant 5.000000e-01 : f32
    %57 = arith.mulf %56, %cst_25 : f32
    %c0_26 = arith.constant 0 : index
    %58 = memref.load %arg5[%c0_26] : memref<1xf32, #tpu.memory_space<smem>>
    memref.store %57, %arg5[%c0_26] : memref<1xf32, #tpu.memory_space<smem>>
    return
  }
}

</mosaic_0001>

<bundles_post_ra>
// kernel: tpu_custom_call.1
= control target key start
LH: loop header
LB: loop body
LE: loop exit
PB: predicated region body
PF: predicated region fallthrough
CT: control target
= control target key end

     0   :  { %11 = vsyncpa [#allocation3], 0  ;;  %s715_s0 = inlined_call_operand.vmem [shape: bf16[2,32], index: 0, kind: input, shape index: {}]   ;;  %s716_s1 = inlined_call_operand.vmem [shape: s32[2,1], index: 1, kind: input, shape index: {}]   ;;  %s717_s2 = inlined_call_operand.hbm [shape: bf16[224,128], index: 2, kind: input, shape index: {}]   ;;  %s718_s3 = inlined_call_operand.hbm [shape: f32[32,128], index: 3, kind: input, shape index: {}]   ;;  %s719_s4 = inlined_call_operand.hbm [shape: f32[2,128], index: 4, kind: output, shape index: {0}]   ;;  %s720_s5 = inlined_call_operand.hbm [shape: f32[1], index: 5, kind: output, shape index: {1}]  }
   0x1   :  { %12 = vsyncpa [#allocation7], 0 }
   0x2   :  { %13 = vsyncpa [#allocation4], 0 }
   0x3   :  { %14 = vsyncpa [#allocation5], 0  ;;  %s627_s18 = smov [#allocation2]  }
   0x4   :  { %s24_s19 = sshll.u32 %s627_s18, 4  ;;  %s25_s19 = int_to_ptr.vmem [resolvable:$true] %s24_s19 }
   0x5   :  { %s559_s20 = scalar_lea.vmem %s25_s19, 1792  ;;  %p564_p1 = scmp.lt.s32.totalorder %s25_s19, %s25_s19 }
   0x6   :  { %p560_p0 = scmp.ne.s32.totalorder %s25_s19, %s559_s20  ;;  %p565_p2 = scmp.lt.s32.totalorder %s559_s20, %s559_s20 }
   0x8   :  { %p566_p3 = por %p565_p2, %p564_p1 }
   0xa   :  { %p567_p4 = pnand %p566_p3, %p560_p0 }
   0xc   :  { %570 = shalt.err (!%p567_p4)
}
   0xd   :  { %s628_s21 = smov 64   ;;  %s629_s22 = smov 4  }
   0xe   :  { %30 = dma.hbm_to_vmem [thread:$0]  %s717_s2, 1792, %s25_s19, [#allocation3], %s628_s21, %s628_s21, %s629_s22  }
   0xf   :  { %s630_s25 = smov [#allocation6]  }
  0x10   :  { %s36_s26 = sshll.u32 %s630_s25, 4  ;;  %s37_s26 = int_to_ptr.vmem [resolvable:$true] %s36_s26 }
  0x11   :  { %s579_s27 = scalar_lea.vmem %s37_s26, 512  ;;  %p584_p6 = scmp.lt.s32.totalorder %s37_s26, %s37_s26 }
  0x12   :  { %p580_p5 = scmp.ne.s32.totalorder %s37_s26, %s579_s27  ;;  %p585_p7 = scmp.lt.s32.totalorder %s579_s27, %s579_s27 }
  0x14   :  { %p586_p8 = por %p585_p7, %p584_p6 }
  0x16   :  { %p587_p9 = pnand %p586_p8, %p580_p5 }
  0x18   :  { %590 = shalt.err (!%p587_p9)
}
  0x19   :  { %s631_s28 = smov 128   ;;  %s632_s29 = smov 8  }
  0x1a   :  { %42 = dma.hbm_to_vmem [thread:$0]  %s718_s3, 512, %s37_s26, [#allocation7], %s631_s28, %s631_s28, %s632_s29  }
  0x1b   :  { %619 = dma.done.wait [#allocation3], 1792  }
  0x1c   :  { %620 = vsyncadd [#allocation3], 4294965504 }
  0x1d   :  { %621 = dma.done.wait [#allocation7], 512  }
  0x1e   :  { %622 = vsyncadd [#allocation7], 4294966784  ;;  %v633_v0 = vmov 0.0   ;;  %vm634_vm0 = vmmov 0   ;;  %v533_v1 = vld [vmem:[#allocation2 + $0x8] sm:$0xff]   ;;  %v534_v2 = vld [vmem:[#allocation2] sm:$0xff]   ;;  %v377_v52 = vlaneseq }
  0x1f   :  { %475 = vmatprep.subr.bf16.mxu0 %v633_v0  ;;  %479 = vmatprep.mubr.msk.bf16.mxu0 %vm634_vm0, %v633_v0  ;;  %v535_v3 = vld [vmem:[#allocation2 + $0x28] sm:$0xff]   ;;  %v50_v4 = vld [vmem:[%s715_s0] sm:$0x1]  ;;  %vm72_vm1 = vcmask 261120   ;;  %v537_v6 = vld [vmem:[#allocation2 + $0x18] sm:$0xff]   ;;  %vm155_vm2 = vcmask 523264  }
  0x20   :  { %483 = vmatprep.subr.bf16.mxu1 %v633_v0  ;;  %491 = vmatprep.mubr.msk.bf16.mxu1 %vm634_vm0, %v633_v0  ;;  %v536_v5 = vld [vmem:[#allocation2 + $0x20] sm:$0xff]   ;;  %v538_v7 = vld [vmem:[#allocation2 + $0x10] sm:$0xff]   ;;  %v539_v8 = vld [vmem:[#allocation2 + $0x48] sm:$0xff]   ;;  %v635_v40 = vmov 0   ;;  %vm364_vm3 = vcmask 1041408   ;;  %v378_v53 = vand.u32 127, %v377_v52 }
  0x21   :  { %476 = vmatpush3.bf16.msra.mxu0 %v533_v1  ;;  %484 = vmatpush3.bf16.msra.mxu1 %v535_v3  ;;  %v540_v9 = vld [vmem:[#allocation2 + $0x40] sm:$0xff]   ;;  %v434_v10 = vld [vmem:[#allocation6] ss:$0 sm:$0xff]  ;;  %v541_v18 = vld [vmem:[#allocation2 + $0x38] sm:$0xff]   ;;  %vm391_vm5 = vcmask 1024  }
  0x22   :  { %477 = vmatprep.subr.bf16.mxu0 %v633_v0  ;;  %485 = vmatprep.subr.bf16.mxu1 %v633_v0  ;;  %v542_v19 = vld [vmem:[#allocation2 + $0x30] sm:$0xff]   ;;  %v543_v20 = vld [vmem:[#allocation2 + $0x68] sm:$0xff]   ;;  %v544_v21 = vld [vmem:[#allocation2 + $0x60] sm:$0xff]  }
  0x23   :  { %v438_v22 = vld [vmem:[#allocation6 + $0x8] ss:$0 sm:$0xff]  ;;  %v546_v31 = vld [vmem:[#allocation2 + $0x50] sm:$0xff]   ;;  %v444_v32 = vld [vmem:[#allocation6 + $0x10] ss:$0 sm:$0xff]  ;;  %532 = vset.pattern.permute.xlu0 %v635_v40 }
  0x24   :  { %v545_v30 = vld [vmem:[#allocation2 + $0x58] sm:$0xff]   ;;  %v450_v41 = vld [vmem:[#allocation6 + $0x18] ss:$0 sm:$0xff]  ;;  %v379_v48 = vld [vmem:[%s716_s1] sm:$0x3]  ;;  %s636_s1 = smov [#allocation8]  }
  0x25   :  { %478 = vmatpush3.bf16.msra.mxu0 %v534_v2  ;;  %486 = vmatpush3.bf16.msra.mxu1 %v536_v5  ;;  %s411_s8 = sshll.u32 %s636_s1, 4  ;;  %s412_s8 = int_to_ptr.vmem [resolvable:$true] %s411_s8 }
  0x26   :  { %495 = vmatprep.subr.bf16.mxu0 %v633_v0  ;;  %487 = vmatprep.subr.bf16.mxu1 %v633_v0  ;;  %s591_s9 = scalar_lea.vmem %s412_s8, 32  ;;  %p596_p11 = scmp.lt.s32.totalorder %s412_s8, %s412_s8 }
  0x27   :  { %p592_p10 = scmp.ne.s32.totalorder %s412_s8, %s591_s9  ;;  %p597_p12 = scmp.lt.s32.totalorder %s591_s9, %s591_s9 }
  0x28   :  { %480 = vmatmul.mubr.msk.bf16.vlgmr.msra.gmra.mxu0 %vm72_vm1, %v50_v4 }
  0x29   :  { %503 = vmatprep.mubr.msk.bf16.mxu0 %vm634_vm0, %v633_v0  ;;  %488 = vmatpush3.bf16.msra.mxu1 %v537_v6  ;;  %p598_p13 = por %p597_p12, %p596_p11 }
  0x2a   :  { %489 = vmatprep.subr.bf16.mxu1 %v633_v0  ;;  %496 = vmatpush3.bf16.msra.mxu0 %v539_v8 }
  0x2b   :  { %497 = vmatprep.subr.bf16.mxu0 %v633_v0  ;;  %p599_p0 = pnand %p598_p13, %p592_p10 }
  0x2d   :  { %490 = vmatpush3.bf16.msra.mxu1 %v538_v7 }
  0x2e   :  { %507 = vmatprep.subr.bf16.mxu1 %v633_v0  ;;  %498 = vmatpush3.bf16.msra.mxu0 %v540_v9 }
  0x2f   :  { %499 = vmatprep.subr.bf16.mxu0 %v633_v0 }
  0x32   :  { %500 = vmatpush3.bf16.msra.mxu0 %v541_v18 }
  0x33   :  { %501 = vmatprep.subr.bf16.mxu0 %v633_v0 }
  0x36   :  { %502 = vmatpush3.bf16.msra.mxu0 %v542_v19 }
  0xe8   :  { %v110_v11 = vpop.f32.mrf.mxu0 }
  0xe9   :  { %v111_v12 = vadd.f32 %v434_v10, %v110_v11 }
  0xea   :  { %v481_v13 = vpop.f32.mrf.mxu0 }
  0xeb   :  { %v116_v14 = vmax.f32 %v111_v12, 0.0 }
  0xec   :  { %v113_v15 = vpop.f32.mrf.mxu0 }
  0xed   :  { %v117_v16 = vpack.c.bf16 %v116_v14, %v116_v14 }
  0xee   :  { %v482_v17 = vpop.f32.mrf.mxu0 }
  0xef   :  { %492 = vmatmul.mubr.msk.bf16.vlgmr.msra.gmra.mxu1 %vm155_vm2, %v117_v16 }
  0xf0   :  { %515 = vmatprep.mubr.msk.bf16.mxu1 %vm634_vm0, %v633_v0  ;;  %508 = vmatpush3.bf16.msra.mxu1 %v543_v20 }
  0xf1   :  { %509 = vmatprep.subr.bf16.mxu1 %v633_v0 }
  0xf4   :  { %510 = vmatpush3.bf16.msra.mxu1 %v544_v21 }
  0xf5   :  { %511 = vmatprep.subr.bf16.mxu1 %v633_v0 }
  0xf8   :  { %512 = vmatpush3.bf16.msra.mxu1 %v545_v30 }
  0xf9   :  { %513 = vmatprep.subr.bf16.mxu1 %v633_v0 }
  0xfc   :  { %514 = vmatpush3.bf16.msra.mxu1 %v546_v31 }
 0x1af   :  { %v193_v23 = vpop.f32.mrf.mxu1 }
 0x1b0   :  { %v194_v24 = vadd.f32 %v438_v22, %v193_v23 }
 0x1b1   :  { %v493_v25 = vpop.f32.mrf.mxu1 }
 0x1b2   :  { %v199_v26 = vmax.f32 %v194_v24, 0.0 }
 0x1b3   :  { %v196_v27 = vpop.f32.mrf.mxu1 }
 0x1b4   :  { %v200_v28 = vpack.c.bf16 %v199_v26, %v199_v26 }
 0x1b5   :  { %v494_v29 = vpop.f32.mrf.mxu1 }
 0x1b6   :  { %504 = vmatmul.mubr.msk.bf16.vlgmr.msra.gmra.mxu0 %vm155_vm2, %v200_v28 }
 0x276   :  { %v275_v33 = vpop.f32.mrf.mxu0 }
 0x277   :  { %v276_v34 = vadd.f32 %v444_v32, %v275_v33 }
 0x278   :  { %v505_v35 = vpop.f32.mrf.mxu0 }
 0x279   :  { %v281_v36 = vmax.f32 %v276_v34, 0.0 }
 0x27a   :  { %v278_v37 = vpop.f32.mrf.mxu0 }
 0x27b   :  { %v282_v38 = vpack.c.bf16 %v281_v36, %v281_v36 }
 0x27c   :  { %v506_v39 = vpop.f32.mrf.mxu0 }
 0x27d   :  { %516 = vmatmul.mubr.msk.bf16.vlgmr.msra.gmra.mxu1 %vm155_vm2, %v282_v38 }
 0x33d   :  { %v357_v42 = vpop.f32.mrf.mxu1 }
 0x33e   :  { %v358_v43 = vadd.f32 %v450_v41, %v357_v42 }
 0x33f   :  { %v517_v44 = vpop.f32.mrf.mxu1 }
 0x340   :  { %363 = vst [vmem:[#allocation8] sm:$0x3] %v358_v43  ;;  %v365_v45 = vsel %vm364_vm3, %v358_v43, -inf }
 0x341   :  { %366 = vmax.xlane.f32.xlu0 %v365_v45  ;;  %v360_v46 = vpop.f32.mrf.mxu1 }
 0x343   :  { %v518_v47 = vpop.f32.mrf.mxu1 }
 0x357   :  { %381 = vperm.xlu0 %532, %v379_v48  }
 0x3ca   :  { %v367_v49 = vpop.xlane.xlu0 %366 }
 0x3cb   :  { %v368_v50 = vsub.f32 %v358_v43, %v367_v49 }
 0x3cd   :  { %v369_v51 = vmul.f32 1.442695, %v368_v50 }
 0x3cf   :  { %547 = vpow2.f32 %v369_v51 }
 0x3d2   :  { %v382_v54 = vpop.permute.xlu0 %381 }
 0x3d3   :  { %vm383_vm4 = vcmp.eq.s32.totalorder %v378_v53, %v382_v54 }
 0x3d4   :  { %v456_v55 = vsel %vm383_vm4, 1.0, %v633_v0 }
 0x3d5   :  { %v386_v58 = vmul.f32 %v456_v55, %v358_v43 }
 0x3d7   :  { %v387_v59 = vsel %vm364_vm3, %v386_v58, 0.0 }
 0x3dc   :  { %v548_v56 = vpop.eup %547 }
 0x3dd   :  { %v371_v57 = vsel %vm364_vm3, %v548_v56, 0.0 }
 0x3de   :  { %372 = vadd.xlane.f32.xlu1 %v371_v57 }
 0x3e2   :  { %388 = vadd.xlane.f32.xlu1 %v387_v59 }
 0x467   :  { %v373_v60 = vpop.xlane.xlu1 %372 }
 0x468   :  { %549 = vlog2.f32 %v373_v60 }
 0x46b   :  { %v389_v1 = vpop.xlane.xlu1 %388 }
 0x475   :  { %v550_v61 = vpop.eup %549 }
 0x476   :  { %v375_v62 = vmul.f32 0.6931472, %v550_v61 }
 0x478   :  { %v376_v63 = vadd.f32 %v375_v62, %v367_v49 }
 0x47a   :  { %v390_v2 = vsub.f32 %v376_v63, %v389_v1 }
 0x47c   :  { %v392_v3 = vsel %vm391_vm5, %v390_v2, 0.0 }
 0x47d   :  { %393 = vadd.xlane.f32.xlu1 %v392_v3 }
 0x47e   :  { %602 = shalt.err (!%p599_p0)
}
 0x47f   :  { %414 = dma.vmem_to_hbm [thread:$0]  %s412_s8, 32, %s719_s4, [#allocation4]  }
 0x480   :  { %s637_s14 = smov [#allocation9]  }
 0x506   :  { %v394_v0 = vpop.xlane.xlu1 %393 }
 0x507   :  { %v395_v4 = vrot.slane %v394_v0, 4 }
 0x509   :  { %v396_v5 = vadd.f32 %v395_v4, %v394_v0 }
 0x50b   :  { %v397_v6 = vrot.slane %v396_v5, 2 }
 0x50d   :  { %v398_v7 = vadd.f32 %v397_v6, %v396_v5 }
 0x50f   :  { %v399_v8 = vrot.slane %v398_v7, 1 }
 0x511   :  { %v400_v9 = vadd.f32 %v399_v8, %v398_v7 }
 0x513   :  { %519 = vpush %v400_v9 }
 0x544   :  { %s520_s12 = spop %519 }
 0x545   :  { %s402_s13 = smul.f32 0.5, %s520_s12 }
 0x547   :  { %404 = sst [smem:[#allocation9]] %s402_s13 }
 0x548   :  { %422 = dma.smem_to_hbm %s637_s14, 16, %s720_s5, [#allocation5]  }
 0x549   :  { %623 = dma.done.wait [#allocation4], 32  }
 0x54a   :  { %624 = vsyncadd [#allocation4], 4294967264 }
 0x54b   :  { %625 = dma.done.wait [#allocation5], 16  }
 0x54c   :  { %626 = vsyncadd [#allocation5], 4294967280 }
 0x54d   :  { %429 = sfence }
 0x54e   :  { %430 = vsyncpa [#allocation3], 1 }
 0x54f   :  { %431 = vsyncpa [#allocation7], 1 }
 0x550   :  { %432 = vsyncpa [#allocation4], 1 }
 0x551   :  { %433 = vsyncpa [#allocation5], 1 }

</bundles_post_ra>
